<compile_context>
chip_gen: v5e
topology: v5e:2x2
jax: 0.10.0
libtpu: 0.0.40
codegen_flags: <defaults>
</compile_context>

<pallas_src>
import jax
import jax.numpy as jnp
from jax.experimental import pallas as pl
from jax.experimental.pallas import tpu as pltpu


def _round_up(x: int, m: int) -> int:
    return (x + m - 1) // m * m


def _cdiv(x: int, m: int) -> int:
    return (x + m - 1) // m


def _vmem_capacity_bytes() -> int:
    try:
        info = pltpu.get_tpu_info()
        cap = int(getattr(info, "vmem_capacity_bytes", 0) or 0)
        if cap > 0:
            return cap
    except Exception:
        pass
    return 64 << 20  # conservative default: v7x per-TensorCore VMEM


def _dot_abt(a_tile, b_tile):
    # Contract the trailing (feature) axis of both tiles: [r, k] x [c, k] -> [r, c].
    return jax.lax.dot_general(
        a_tile, b_tile,
        dimension_numbers=(((1,), (1,)), ((), ())),
        preferred_element_type=jnp.float32,
    )


def _abt_kernel_single_k(a_ref, b_ref, o_ref):
    # Whole contraction in one step: write the output block directly (no scratch).
    o_ref[...] = _dot_abt(a_ref[...], b_ref[...]).astype(o_ref.dtype)


def _abt_kernel_acc(a_ref, b_ref, o_ref, acc_ref):
    # K-reduction variant (grid axis 2 is the "arbitrary" reduction axis).
    @pl.when(pl.program_id(2) == 0)
    def _():
        acc_ref[...] = jnp.zeros_like(acc_ref)

    acc_ref[...] += _dot_abt(a_ref[...], b_ref[...])

    @pl.when(pl.program_id(2) == pl.num_programs(2) - 1)
    def _():
        o_ref[...] = acc_ref[...].astype(o_ref.dtype)


def _matmul_abt(a: jax.Array, b: jax.Array, out_dtype, *,
                row_tile: int = 512, col_tile: int = 512,
                k_tile_cap: int | None = None) -> jax.Array:
    """Computes a @ b.T with a Pallas TPU kernel.  a: [R, D], b: [C, D] -> [R, C]."""
    R, D = a.shape
    C, Db = b.shape
    assert D == Db, "feature dims must match"

    cap = _vmem_capacity_bytes()
    # Usable tile budget: leave generous headroom for Mosaic internals / semaphores.
    budget = max(min(cap - (16 << 20), (3 * cap) // 4), 16 << 20)

    # Row (sublane) / column (lane) tiles: take the whole dim when it fits
    # (pins the small operand resident), otherwise a large lane/MXU-friendly tile.
    tr = R if R <= row_tile else row_tile     # row_tile is a multiple of 8
    tc = C if C <= col_tile else col_tile     # col_tile is a multiple of 128
    gi = _cdiv(R, tr)
    gj = _cdiv(C, tc)

    # Megacore (v7x): if there is only one parallel block but enough columns, split the
    # column axis in two (keeping >=128 lanes per block) so both TensorCores get work.
    if gi * gj == 1 and C >= 256:
        tc = _round_up(_cdiv(C, 2), 128)
        gj = _cdiv(C, tc)

    # K tile sized from the remaining VMEM budget (double-buffered inputs + output blocks
    # + f32 accumulator), floored to the 128-lane granule.
    itemsize = 4  # f32 compute path (inputs are float32 in LinearModel)
    fixed = 3 * tr * tc * itemsize
    tk_max = (budget - fixed) // (2 * itemsize * (tr + tc))
    tk_max = max((tk_max // 128) * 128, 128)
    if k_tile_cap is not None:
        tk_max = max(min(tk_max, _round_up(k_tile_cap, 128)), 128)

    Dp = _round_up(D, 128)
    if Dp <= tk_max:
        tk, single_k = Dp, True
    else:
        tk, single_k = tk_max, False
        Dp = _round_up(D, tk)
    gk = Dp // tk

    # Pad the contraction axis only (zero padding is exact for the dot product).
    # M/N remainders are handled by cdiv grids + edge-block masking, not padding.
    if Dp != D:
        a = jnp.pad(a, ((0, 0), (0, Dp - D)))
        b = jnp.pad(b, ((0, 0), (0, Dp - D)))

    # VMEM limit derived from the actual working set, clamped below physical VMEM.
    ws = itemsize * (2 * (tr + tc) * tk + 2 * tr * tc + (0 if single_k else tr * tc))
    vmem_limit = int(min(max(ws + (8 << 20), 16 << 20), cap - (8 << 20)))

    # Grid ordering: put the parallel axis with more blocks outermost (megacore occupancy);
    # the reduction axis (if any) is always innermost / "arbitrary".
    if gj >= gi:
        pgrid = (gj, gi)
        a_idx = (lambda j, i: (i, 0)) if single_k else (lambda j, i, k: (i, k))
        b_idx = (lambda j, i: (j, 0)) if single_k else (lambda j, i, k: (j, k))
        o_idx = (lambda j, i: (i, j)) if single_k else (lambda j, i, k: (i, j))
    else:
        pgrid = (gi, gj)
        a_idx = (lambda i, j: (i, 0)) if single_k else (lambda i, j, k: (i, k))
        b_idx = (lambda i, j: (j, 0)) if single_k else (lambda i, j, k: (j, k))
        o_idx = (lambda i, j: (i, j)) if single_k else (lambda i, j, k: (i, j))

    if single_k:
        kernel = _abt_kernel_single_k
        scratch = []
        semantics = ("parallel", "parallel")
    else:
        pgrid = pgrid + (gk,)
        kernel = _abt_kernel_acc
        scratch = [pltpu.VMEM((tr, tc), jnp.float32)]
        semantics = ("parallel", "parallel", "arbitrary")

    return pl.pallas_call(
        kernel,
        out_shape=jax.ShapeDtypeStruct((R, C), out_dtype),
        grid_spec=pltpu.PrefetchScalarGridSpec(
            num_scalar_prefetch=0,
            grid=pgrid,
            in_specs=[
                pl.BlockSpec((tr, tk), a_idx),
                pl.BlockSpec((tc, tk), b_idx),
            ],
            out_specs=pl.BlockSpec((tr, tc), o_idx),
            scratch_shapes=scratch,
        ),
        compiler_params=pltpu.CompilerParams(
            dimension_semantics=semantics,
            vmem_limit_bytes=vmem_limit,
        ),
    )(a, b)


def linear_model_forward(weights: jax.Array, X: jax.Array, **tile_kwargs) -> jax.Array:
    """LinearModel.forward: weights @ X.T.

    weights: [M, D] float32, X: [N, D] float32 -> [M, N] float32.
    """
    M, D = weights.shape
    N, D2 = X.shape
    assert D == D2, "feature dims must match"
    out_dtype = jnp.result_type(weights.dtype, X.dtype)

    # Orientation: keep the result's lane (last) axis wide and avoid the wrapper-side
    # transpose (an extra HBM pass over the result) unless N is short and M is lane-worthy.
    if N < 128 and M >= 128:
        # Kernel computes (X @ W.T) = out.T with M on lanes; transpose the small result.
        return _matmul_abt(X, weights, out_dtype, **tile_kwargs).T
    return _matmul_abt(weights, X, out_dtype, **tile_kwargs)


if __name__ == "__main__":
    key = jax.random.PRNGKey(0)

    def _check(name, M, D, N, subkey, **kw):
        k_w, k_x = jax.random.split(subkey)
        w = jax.random.normal(k_w, (M, D), dtype=jnp.float32)
        x = jax.random.normal(k_x, (N, D), dtype=jnp.float32)
        out = jax.block_until_ready(linear_model_forward(w, x, **kw))
        ref = w @ x.T
        assert out.shape == (M, N), (name, out.shape)
        assert jnp.allclose(out, ref, atol=1e-3, rtol=1e-3), f"mismatch vs reference ({name})"

    keys = jax.random.split(key, 6)

    # 1) Nominal small LinearModel size (single grid step, direct layout).
    _check("nominal", M=16, D=128, N=8, subkey=keys[0])

    # 2) Non-aligned shapes: only D gets zero-padded; M/N stay unpadded.
    _check("unaligned", M=30, D=100, N=6, subkey=keys[1])

    # 3) Streaming batch: W pinned resident, X streamed once, column axis split for megacore.
    _check("streamed", M=16, D=256, N=512, subkey=keys[2])

    # 4) Transposed layout path (small batch, many classifiers -> M on lanes, wrapper .T).
    _check("transposed", M=256, D=128, N=8, subkey=keys[3])

    # 5) K-reduction (accumulator) path, forced via a small K-tile cap.
    _check("k_reduction", M=24, D=384, N=40, subkey=keys[4], k_tile_cap=128)

    # 6) Edge blocks on both row and column axes (cdiv grid, masked partial stores).
    _check("edge_blocks", M=20, D=128, N=200, subkey=keys[5], row_tile=8, col_tile=128)

    print("KERNEL_OK")
</pallas_src>

<mosaic_0001>
module attributes {stable_mosaic.version = 11 : i64} {
  func.func @_abt_kernel_single_k(%arg0: i32, %arg1: i32, %arg2: memref<16x128xf32, #tpu.memory_space<vmem>>, %arg3: memref<8x128xf32, #tpu.memory_space<vmem>>, %arg4: memref<16x8xf32, #tpu.memory_space<vmem>>) attributes {dimension_semantics = [#tpu.dimension_semantics<parallel>, #tpu.dimension_semantics<parallel>], iteration_bounds = array<i64: 1, 1>, scalar_prefetch = 0 : i64, scratch_operands = 0 : i64, tpu.core_type = #tpu.core_type<tc>, window_params = [{transform_indices = @transform_0, window_bounds = array<i64: 16, 128>}, {transform_indices = @transform_1, window_bounds = array<i64: 8, 128>}, {transform_indices = @transform_2, window_bounds = array<i64: 16, 8>}]} {
    %c0 = arith.constant 0 : index
    %c0_0 = arith.constant 0 : index
    %0 = vector.load %arg2[%c0, %c0_0] : memref<16x128xf32, #tpu.memory_space<vmem>>, vector<16x128xf32>
    %c0_1 = arith.constant 0 : index
    %c0_2 = arith.constant 0 : index
    %1 = vector.load %arg3[%c0_1, %c0_2] : memref<8x128xf32, #tpu.memory_space<vmem>>, vector<8x128xf32>
    %cst = arith.constant dense<0.000000e+00> : vector<16x8xf32>
    %2 = tpu.matmul %0, %1, %cst {dimension_numbers = #tpu.dot_dimension_numbers<[1], [1], [0], [0], [0, 0, 1, 0], [], []>} : vector<16x128xf32>, vector<8x128xf32>, vector<16x8xf32> -> vector<16x8xf32>
    %c0_3 = arith.constant 0 : index
    %c0_4 = arith.constant 0 : index
    %3 = vector.load %arg4[%c0_3, %c0_4] : memref<16x8xf32, #tpu.memory_space<vmem>>, vector<16x8xf32>
    tpu.vector_store %arg4[%c0_3, %c0_4], %2 {strides = array<i32>} : memref<16x8xf32, #tpu.memory_space<vmem>>, vector<16x8xf32>,
    return
  }
  func.func @transform_0(%arg0: i32, %arg1: i32) -> (i32, i32) {
    %c0_i32 = arith.constant 0 : i32
    %c0_i32_0 = arith.constant 0 : i32
    return %arg1, %c0_i32 : i32, i32
  }
  func.func @transform_1(%arg0: i32, %arg1: i32) -> (i32, i32) {
    %c0_i32 = arith.constant 0 : i32
    %c0_i32_0 = arith.constant 0 : i32
    return %arg0, %c0_i32 : i32, i32
  }
  func.func @transform_2(%arg0: i32, %arg1: i32) -> (i32, i32) {
    %c0_i32 = arith.constant 0 : i32
    return %arg1, %arg0 : i32, i32
  }
}

</mosaic_0001>

<bundles_post_ra>
// kernel: tpu_custom_call.1
= control target key start
LH: loop header
LB: loop body
LE: loop exit
PB: predicated region body
PF: predicated region fallthrough
CT: control target
= control target key end

     0   :  { %7 = vsyncpa [#allocation3], 0  ;;  %s164_s0 = inlined_call_operand.hbm [shape: f32[16,128], index: 0, kind: input, shape index: {}]   ;;  %s165_s1 = inlined_call_operand.hbm [shape: f32[8,128], index: 1, kind: input, shape index: {}]   ;;  %s166_s2 = inlined_call_operand.vmem [shape: f32[16,8], index: 2, kind: output, shape index: {}]  }
   0x1   :  { %s13_s11 = sshll.u32 %s164_s0, 4  ;;  %s14_s11 = int_to_ptr.hbm [resolvable:$true] %s13_s11 }
   0x2   :  { %8 = vsyncpa [#allocation5], 0  ;;  %s133_s12 = smov [#allocation2]   ;;  %s27_s16 = sshll.u32 %s165_s1, 4  ;;  %s28_s16 = int_to_ptr.hbm [resolvable:$true] %s27_s16 }
   0x3   :  { %s15_s13 = sshll.u32 %s133_s12, 4  ;;  %s134_s17 = smov 128   ;;  %s16_s13 = int_to_ptr.vmem [resolvable:$true] %s15_s13 }
   0x4   :  { %s135_s18 = smov 8   ;;  %s136_s19 = smov [#allocation4]  }
   0x5   :  { %21 = dma.hbm_to_vmem [thread:$0]  %s14_s11, 256, %s16_s13, [#allocation3], %s134_s17, %s134_s17, %s135_s18  }
   0x6   :  { %s29_s20 = sshll.u32 %s136_s19, 4  ;;  %s30_s20 = int_to_ptr.vmem [resolvable:$true] %s29_s20 }
   0x7   :  { %32 = dma.hbm_to_vmem [thread:$0]  %s28_s16, 128, %s30_s20, [#allocation5]  }
   0x8   :  { %129 = dma.done.wait [#allocation3], 256  }
   0x9   :  { %130 = vsyncadd [#allocation3], 4294967040 }
   0xa   :  { %131 = dma.done.wait [#allocation5], 128  }
   0xb   :  { %132 = vsyncadd [#allocation5], 4294967168  ;;  %v43_v0 = vld [vmem:[#allocation4] sm:$0xff]  ;;  %v41_v1 = vld [vmem:[#allocation2] sm:$0xff]  ;;  %vm67_vm0 = vcmask 64512  }
   0xc   :  { %59 = vmatpush.xpose.msra.mxu0 %v43_v0  ;;  %76 = vmatpush.xpose.msra.mxu1 %v43_v0  ;;  %v42_v2 = vld [vmem:[#allocation2 + $0x8] sm:$0xff] }
   0xf   :  { %60 = vmatmul.f32.vlgmr.msra.gmra.mxu0 %v41_v1  ;;  %63 = vmatmul.f32.vlgmr.msra.gmra.mxu1 %v42_v2 }
  0x8c   :  { %v61_v3 = vpop.f32.mrf.mxu0  ;;  %v64_v4 = vpop.f32.mrf.mxu1 }
  0x8d   :  { %68 = vst.msk [vmem:[%s166_s2] sm:$0xff] %vm67_vm0, %v61_v3 }
  0x8e   :  { %69 = vst.msk [vmem:[%s166_s2 + $0x8] sm:$0xff] %vm67_vm0, %v64_v4 }
  0x8f   :  { %74 = vsyncpa [#allocation3], 1 }
  0x90   :  { %75 = vsyncpa [#allocation5], 1 }

</bundles_post_ra>
